<compile_context>
chip_gen: v5e
topology: v5e:2x2
jax: 0.10.0
libtpu: 0.0.40
codegen_flags: <defaults>
</compile_context>

<pallas_src>
import jax
import jax.numpy as jnp
from jax.experimental import pallas as pl
from jax.experimental.pallas import tpu as pltpu

LN_EPS = 1e-5  # PyTorch nn.LayerNorm default eps


def _round_up(x, m):
    return ((x + m - 1) // m) * m


def _round_down(x, m):
    return (x // m) * m


def _vmem_capacity_bytes():
    """Per-core VMEM capacity; conservative 64 MiB fallback (v7x) if query fails."""
    try:
        info = pltpu.get_tpu_info()
        cap = getattr(info, "vmem_capacity_bytes", None)
        if cap:
            return int(cap)
    except Exception:
        pass
    return 64 * 1024 * 1024


def _linktower_kernel(h_ref, c_ref, gb_ref, o_ref):
    # Elementwise add, then LayerNorm over the last (hidden) axis, then affine.
    # All stats in f32, single reduction pass (per-row only -> partial-block safe).
    x = h_ref[...].astype(jnp.float32) + c_ref[...].astype(jnp.float32)
    inv_h = 1.0 / x.shape[-1]
    mean = jnp.sum(x, axis=-1, keepdims=True) * inv_h
    meansq = jnp.sum(x * x, axis=-1, keepdims=True) * inv_h
    var = jnp.maximum(meansq - mean * mean, 0.0)
    inv = jax.lax.rsqrt(var + LN_EPS)
    gb = gb_ref[...]                  # (2, H) resident, f32: [gamma; beta]
    gamma = gb[0:1, :]                # (1, H) broadcasts over rows
    beta = gb[1:2, :]                 # (1, H)
    o_ref[...] = ((x - mean) * inv * gamma + beta).astype(o_ref.dtype)


def link_tower(hidden_states, cross_modal_hidden_states, gamma, beta, *,
               per_stream_bytes_target=4 << 20):
    """hidden_states, cross_modal_hidden_states: (B, S, H); gamma/beta: (H,)."""
    assert hidden_states.shape == cross_modal_hidden_states.shape
    B, S, H = hidden_states.shape
    rows = B * S
    dtype = hidden_states.dtype
    itemsize = jnp.dtype(dtype).itemsize

    # --- VMEM budgets derived per generation --------------------------------
    vmem_cap = _vmem_capacity_bytes()
    tile_budget = vmem_cap // 4                 # 32 MiB on v5e/v6e, 16 MiB on v7x
    vmem_limit = (vmem_cap * 3) // 4            # scoped limit with headroom

    # --- choose a row block (byte-based, multiple of 16) --------------------
    # Real per-row VMEM footprint: 3 streams (h, c, out) x 2 double-buffers in
    # `dtype` + ~3 full-tile f32 compute temporaries (x, normalized, staging).
    per_row_bytes = 6 * H * itemsize + 3 * H * 4
    rb_vmem_cap = max(16, _round_down(tile_budget // per_row_bytes, 16))
    rb_bytes = max(16, _round_down(per_stream_bytes_target // (H * itemsize), 16))
    row_block = min(rb_bytes, rb_vmem_cap, max(16, _round_up(rows, 16)))
    row_block = max(16, _round_down(row_block, 16))

    # --- flatten (no padding; partial last block handled by Pallas) ---------
    h2 = hidden_states.reshape(rows, H)
    c2 = cross_modal_hidden_states.reshape(rows, H)
    gb = jnp.stack([gamma, beta], axis=0).astype(jnp.float32)   # (2, H) resident, f32

    grid = (pl.cdiv(rows, row_block),)

    out2 = pl.pallas_call(
        _linktower_kernel,
        out_shape=jax.ShapeDtypeStruct((rows, H), dtype),
        grid_spec=pltpu.PrefetchScalarGridSpec(
            num_scalar_prefetch=0,
            grid=grid,
            in_specs=[
                pl.BlockSpec((row_block, H), lambda i: (i, 0)),  # hidden_states tile
                pl.BlockSpec((row_block, H), lambda i: (i, 0)),  # cross_modal tile
                pl.BlockSpec((2, H), lambda i: (0, 0)),          # [gamma; beta] resident
            ],
            out_specs=pl.BlockSpec((row_block, H), lambda i: (i, 0)),
        ),
        compiler_params=pltpu.CompilerParams(
            dimension_semantics=("parallel",),   # shard row grid across TCs where possible
            vmem_limit_bytes=int(vmem_limit),
        ),
    )(h2, c2, gb)

    return out2.reshape(B, S, H)


def _reference(hidden_states, cross_modal_hidden_states, gamma, beta):
    x = (hidden_states + cross_modal_hidden_states).astype(jnp.float32)
    mean = jnp.mean(x, axis=-1, keepdims=True)
    var = jnp.mean((x - mean) ** 2, axis=-1, keepdims=True)
    return ((x - mean) * jax.lax.rsqrt(var + LN_EPS) * gamma + beta).astype(
        hidden_states.dtype
    )


if __name__ == "__main__":
    B, S, H = 2, 8, 32
    key = jax.random.PRNGKey(0)
    k1, k2 = jax.random.split(key)
    hidden_states = jax.random.normal(k1, (B, S, H), dtype=jnp.float32)
    cross_modal = jax.random.normal(k2, (B, S, H), dtype=jnp.float32)
    # nn.LayerNorm init: weight = ones, bias = zeros (deterministic, in-script)
    gamma = jnp.ones((H,), dtype=jnp.float32)
    beta = jnp.zeros((H,), dtype=jnp.float32)

    out = link_tower(hidden_states, cross_modal, gamma, beta)
    out = jax.block_until_ready(out)

    ref = _reference(hidden_states, cross_modal, gamma, beta)
    assert out.shape == (B, S, H)
    assert jnp.allclose(out, ref, atol=1e-5, rtol=1e-5)
    print("KERNEL_OK")
</pallas_src>

<mosaic_0001>
module attributes {stable_mosaic.version = 11 : i64} {
  func.func @_linktower_kernel(%arg0: i32, %arg1: memref<16x32xf32, #tpu.memory_space<vmem>>, %arg2: memref<16x32xf32, #tpu.memory_space<vmem>>, %arg3: memref<2x32xf32, #tpu.memory_space<vmem>>, %arg4: memref<16x32xf32, #tpu.memory_space<vmem>>) attributes {dimension_semantics = [#tpu.dimension_semantics<parallel>], iteration_bounds = array<i64: 1>, scalar_prefetch = 0 : i64, scratch_operands = 0 : i64, tpu.core_type = #tpu.core_type<tc>, window_params = [{transform_indices = @transform_0, window_bounds = array<i64: 16, 32>}, {transform_indices = @transform_1, window_bounds = array<i64: 16, 32>}, {pipeline_mode = #tpu.pipeline_mode<synchronous>, transform_indices = @transform_2, window_bounds = array<i64: 2, 32>}, {transform_indices = @transform_3, window_bounds = array<i64: 16, 32>}]} {
    %c0 = arith.constant 0 : index
    %c0_0 = arith.constant 0 : index
    %0 = vector.load %arg1[%c0, %c0_0] : memref<16x32xf32, #tpu.memory_space<vmem>>, vector<16x32xf32>
    %c0_1 = arith.constant 0 : index
    %c0_2 = arith.constant 0 : index
    %1 = vector.load %arg2[%c0_1, %c0_2] : memref<16x32xf32, #tpu.memory_space<vmem>>, vector<16x32xf32>
    %2 = arith.addf %0, %1 : vector<16x32xf32>
    %cst = arith.constant dense<0.000000e+00> : vector<16xf32>
    %3 = vector.multi_reduction <add>, %2, %cst [1] : vector<16x32xf32> to vector<16xf32>
    %4 = vector.shape_cast %3 : vector<16xf32> to vector<16x1xf32>
    %cst_3 = arith.constant 3.125000e-02 : f32
    %5 = vector.broadcast %cst_3 : f32 to vector<16x1xf32>
    %6 = arith.mulf %4, %5 : vector<16x1xf32>
    %7 = arith.mulf %2, %2 : vector<16x32xf32>
    %cst_4 = arith.constant dense<0.000000e+00> : vector<16xf32>
    %8 = vector.multi_reduction <add>, %7, %cst_4 [1] : vector<16x32xf32> to vector<16xf32>
    %9 = vector.shape_cast %8 : vector<16xf32> to vector<16x1xf32>
    %cst_5 = arith.constant 3.125000e-02 : f32
    %10 = vector.broadcast %cst_5 : f32 to vector<16x1xf32>
    %11 = arith.mulf %9, %10 : vector<16x1xf32>
    %12 = arith.mulf %6, %6 : vector<16x1xf32>
    %13 = arith.subf %11, %12 : vector<16x1xf32>
    %cst_6 = arith.constant 0.000000e+00 : f32
    %14 = vector.broadcast %cst_6 : f32 to vector<16x1xf32>
    %15 = arith.maximumf %13, %14 : vector<16x1xf32>
    %cst_7 = arith.constant 9.99999974E-6 : f32
    %16 = vector.broadcast %cst_7 : f32 to vector<16x1xf32>
    %17 = arith.addf %15, %16 : vector<16x1xf32>
    %18 = math.rsqrt %17 : vector<16x1xf32>
    %c0_8 = arith.constant 0 : index
    %c0_9 = arith.constant 0 : index
    %19 = vector.load %arg3[%c0_8, %c0_9] : memref<2x32xf32, #tpu.memory_space<vmem>>, vector<2x32xf32>
    %20 = vector.extract_strided_slice %19 {offsets = [0, 0], sizes = [1, 32], strides = [1, 1]} : vector<2x32xf32> to vector<1x32xf32>
    %21 = vector.extract_strided_slice %19 {offsets = [1, 0], sizes = [1, 32], strides = [1, 1]} : vector<2x32xf32> to vector<1x32xf32>
    %22 = vector.broadcast %6 : vector<16x1xf32> to vector<16x32xf32>
    %23 = arith.subf %2, %22 : vector<16x32xf32>
    %24 = vector.broadcast %18 : vector<16x1xf32> to vector<16x32xf32>
    %25 = arith.mulf %23, %24 : vector<16x32xf32>
    %26 = vector.broadcast %20 : vector<1x32xf32> to vector<16x32xf32>
    %27 = arith.mulf %25, %26 : vector<16x32xf32>
    %28 = vector.broadcast %21 : vector<1x32xf32> to vector<16x32xf32>
    %29 = arith.addf %27, %28 : vector<16x32xf32>
    %c0_10 = arith.constant 0 : index
    %c0_11 = arith.constant 0 : index
    %30 = vector.load %arg4[%c0_10, %c0_11] : memref<16x32xf32, #tpu.memory_space<vmem>>, vector<16x32xf32>
    tpu.vector_store %arg4[%c0_10, %c0_11], %29 {strides = array<i32>} : memref<16x32xf32, #tpu.memory_space<vmem>>, vector<16x32xf32>,
    return
  }
  func.func @transform_0(%arg0: i32) -> (i32, i32) {
    %c0_i32 = arith.constant 0 : i32
    %c0_i32_0 = arith.constant 0 : i32
    return %arg0, %c0_i32 : i32, i32
  }
  func.func @transform_1(%arg0: i32) -> (i32, i32) {
    %c0_i32 = arith.constant 0 : i32
    %c0_i32_0 = arith.constant 0 : i32
    return %arg0, %c0_i32 : i32, i32
  }
  func.func @transform_2(%arg0: i32) -> (i32, i32) {
    %c0_i32 = arith.constant 0 : i32
    %c0_i32_0 = arith.constant 0 : i32
    %c0_i32_1 = arith.constant 0 : i32
    return %c0_i32, %c0_i32_0 : i32, i32
  }
  func.func @transform_3(%arg0: i32) -> (i32, i32) {
    %c0_i32 = arith.constant 0 : i32
    %c0_i32_0 = arith.constant 0 : i32
    return %arg0, %c0_i32 : i32, i32
  }
}

</mosaic_0001>

<bundles_post_ra>
// kernel: tpu_custom_call.1
= control target key start
LH: loop header
LB: loop body
LE: loop exit
PB: predicated region body
PF: predicated region fallthrough
CT: control target
= control target key end

     0   :  { %8 = vsyncpa [#allocation3], 0  ;;  %s311_s0 = inlined_call_operand.hbm [shape: f32[16,32], index: 0, kind: input, shape index: {}]   ;;  %s312_s1 = inlined_call_operand.hbm [shape: f32[16,32], index: 1, kind: input, shape index: {}]   ;;  %s313_s2 = inlined_call_operand.hbm [shape: f32[2,32], index: 2, kind: input, shape index: {}]   ;;  %s314_s3 = inlined_call_operand.hbm [shape: f32[16,32], index: 3, kind: output, shape index: {}]  }
   0x1   :  { %9 = vsyncpa [#allocation6], 0 }
   0x2   :  { %10 = vsyncpa [#allocation4], 0  ;;  %s28_s14 = sshll.u32 %s312_s1, 4  ;;  %s258_s15 = smov [#allocation5]   ;;  %s29_s14 = int_to_ptr.hbm [resolvable:$true] %s28_s14 }
   0x3   :  { %s30_s16 = sshll.u32 %s258_s15, 4  ;;  %s15_s19 = sshll.u32 %s311_s0, 4  ;;  %s31_s16 = int_to_ptr.vmem [resolvable:$true] %s30_s16  ;;  %s16_s19 = int_to_ptr.hbm [resolvable:$true] %s15_s19 }
   0x4   :  { %s259_s20 = smov 128   ;;  %s260_s21 = smov 8  }
   0x5   :  { %36 = dma.hbm_to_vmem [thread:$0]  %s29_s14, 256, %s31_s16, [#allocation6], %s259_s20, %s259_s20, %s260_s21  }
   0x6   :  { %s261_s22 = smov [#allocation2]   ;;  %s42_s1 = sshll.u32 %s313_s2, 4  ;;  %s43_s1 = int_to_ptr.hbm [resolvable:$true] %s42_s1 }
   0x7   :  { %s17_s23 = sshll.u32 %s261_s22, 4  ;;  %s262_s0 = smov [#allocation7]   ;;  %s18_s23 = int_to_ptr.vmem [resolvable:$true] %s17_s23 }
   0x8   :  { %23 = dma.hbm_to_vmem [thread:$0]  %s16_s19, 256, %s18_s23, [#allocation3], %s259_s20, %s259_s20, %s260_s21  }
   0x9   :  { %s44_s26 = sshll.u32 %s262_s0, 4  ;;  %s45_s26 = int_to_ptr.vmem [resolvable:$true] %s44_s26 }
   0xa   :  { %47 = dma.hbm_to_vmem [thread:$0]  %s43_s1, 32, %s45_s26, [#allocation6]  }
   0xb   :  { %252 = dma.done.wait [#allocation3], 256  }
   0xc   :  { %253 = vsyncadd [#allocation3], 4294967040 }
   0xd   :  { %254 = dma.done.wait [#allocation6], 288  }
   0xe   :  { %255 = vsyncadd [#allocation6], 4294967008  ;;  %v60_v0 = vld [vmem:[#allocation2] sm:$0xff]  ;;  %v62_v1 = vld [vmem:[#allocation5] sm:$0xff]  ;;  %vm66_vm0 = vcmask 261120   ;;  %s263_s2 = smov [#allocation8]  }
   0xf   :  { %v61_v2 = vld [vmem:[#allocation2 + $0x8] sm:$0xff]  ;;  %v64_v3 = vadd.f32 %v62_v1, %v60_v0  ;;  %v63_v4 = vld [vmem:[#allocation5 + $0x8] sm:$0xff]  ;;  %v113_v33 = vld [vmem:[#allocation7] sm:$0x3]  ;;  %s130_s27 = sshll.u32 %s263_s2, 4  ;;  %s132_s30 = sshll.u32 %s314_s3, 4  ;;  %s131_s27 = int_to_ptr.vmem [resolvable:$true] %s130_s27  ;;  %s133_s30 = int_to_ptr.hbm [resolvable:$true] %s132_s30 }
  0x10   :  { %v65_v7 = vadd.f32 %v63_v4, %v61_v2  ;;  %v118_v38 = vperm.slane %v113_v33, 0  ;;  %v121_v42 = vperm.slane %v113_v33, 1 }
  0x11   :  { %v67_v5 = vsel %vm66_vm0, %v64_v3, 0.0  ;;  %v75_v6 = vmul.f32 %v64_v3, %v64_v3 }
  0x12   :  { %68 = vadd.xlane.f32.xlu0 %v67_v5  ;;  %v76_v9 = vmul.f32 %v65_v7, %v65_v7  ;;  %v70_v10 = vsel %vm66_vm0, %v65_v7, 0.0 }
  0x13   :  { %v77_v8 = vsel %vm66_vm0, %v75_v6, 0.0 }
  0x14   :  { %78 = vadd.xlane.f32.xlu1 %v77_v8  ;;  %v80_v11 = vsel %vm66_vm0, %v76_v9, 0.0 }
  0x1a   :  { %71 = vadd.xlane.f32.xlu0 %v70_v10 }
  0x1c   :  { %81 = vadd.xlane.f32.xlu1 %v80_v11 }
  0x85   :  { %v69_v12 = vpop.xlane.xlu0 %68 }
  0x86   :  { %v73_v13 = vmul.f32 0.03125, %v69_v12 }
  0x87   :  { %v79_v14 = vpop.xlane.xlu1 %78 }
  0x88   :  { %v85_v15 = vmul.f32 %v73_v13, %v73_v13  ;;  %v83_v16 = vmul.f32 0.03125, %v79_v14  ;;  %v114_v36 = vsub.f32 %v64_v3, %v73_v13 }
  0x8a   :  { %v87_v17 = vsub.f32 %v83_v16, %v85_v15 }
  0x8c   :  { %v89_v18 = vmax.f32 %v87_v17, 0.0 }
  0x8d   :  { %v72_v19 = vpop.xlane.xlu0 %71 }
  0x8e   :  { %v91_v20 = vadd.f32 1e-05, %v89_v18  ;;  %v74_v21 = vmul.f32 0.03125, %v72_v19 }
  0x8f   :  { %v82_v22 = vpop.xlane.xlu1 %81 }
  0x90   :  { %152 = vrsqrt.f32 %v91_v20  ;;  %v86_v23 = vmul.f32 %v74_v21, %v74_v21  ;;  %v84_v24 = vmul.f32 0.03125, %v82_v22  ;;  %vm99_vm2 = vweird.f32 %v91_v20 }
  0x91   :  { %v115_v48 = vsub.f32 %v65_v7, %v74_v21 }
  0x92   :  { %v88_v25 = vsub.f32 %v84_v24, %v86_v23 }
  0x94   :  { %v90_v26 = vmax.f32 %v88_v25, 0.0 }
  0x96   :  { %v153_v27 = vpop.eup %152  ;;  %v92_v29 = vadd.f32 1e-05, %v90_v26 }
  0x97   :  { %v94_v28 = vmul.f32 %v153_v27, %v91_v20  ;;  %vm100_vm1 = vweird.f32 %v153_v27 }
  0x98   :  { %154 = vrsqrt.f32 %v92_v29  ;;  %vm101_vm3 = vmor %vm99_vm2, %vm100_vm1  ;;  %vm109_vm5 = vweird.f32 %v92_v29 }
  0x99   :  { %v95_v30 = vmul.f32 %v153_v27, %v94_v28 }
  0x9b   :  { %v96_v31 = vmul.f32 0.5, %v95_v30 }
  0x9d   :  { %v97_v32 = vsub.f32 1.5, %v96_v31 }
  0x9e   :  { %v155_v34 = vpop.eup %154 }
  0x9f   :  { %v98_v35 = vmul.f32 %v153_v27, %v97_v32  ;;  %v104_v37 = vmul.f32 %v155_v34, %v92_v29  ;;  %vm110_vm4 = vweird.f32 %v155_v34 }
  0xa0   :  { %vm111_vm6 = vmor %vm109_vm5, %vm110_vm4 }
  0xa1   :  { %v102_v39 = vsel %vm101_vm3, %v153_v27, %v98_v35  ;;  %v105_v41 = vmul.f32 %v155_v34, %v104_v37 }
  0xa2   :  { %v116_v40 = vmul.f32 %v114_v36, %v102_v39 }
  0xa3   :  { %v106_v43 = vmul.f32 0.5, %v105_v41 }
  0xa4   :  { %v119_v44 = vmul.f32 %v118_v38, %v116_v40 }
  0xa5   :  { %v107_v45 = vsub.f32 1.5, %v106_v43 }
  0xa6   :  { %v122_v46 = vadd.f32 %v121_v42, %v119_v44 }
  0xa7   :  { %v108_v47 = vmul.f32 %v155_v34, %v107_v45 }
  0xa8   :  { %124 = vst.msk [vmem:[#allocation8] sm:$0xff] %vm66_vm0, %v122_v46 }
  0xa9   :  { %v112_v49 = vsel %vm111_vm6, %v155_v34, %v108_v47 }
  0xaa   :  { %v117_v50 = vmul.f32 %v115_v48, %v112_v49 }
  0xac   :  { %v120_v51 = vmul.f32 %v118_v38, %v117_v50 }
  0xae   :  { %v123_v52 = vadd.f32 %v121_v42, %v120_v51 }
  0xb0   :  { %125 = vst.msk [vmem:[#allocation8 + $0x8] sm:$0xff] %vm66_vm0, %v123_v52 }
  0xb1   :  { %138 = dma.vmem_to_hbm [thread:$0]  %s131_s27, 256, %s133_s30, [#allocation4], %s259_s20, %s259_s20, %s260_s21  }
  0xb2   :  { %256 = dma.done.wait [#allocation4], 256  }
  0xb3   :  { %257 = vsyncadd [#allocation4], 4294967040 }
  0xb4   :  { %143 = vsyncpa [#allocation3], 1 }
  0xb5   :  { %144 = vsyncpa [#allocation6], 1 }
  0xb6   :  { %145 = vsyncpa [#allocation4], 1 }

</bundles_post_ra>
